<compile_context>
chip_gen: v7x
topology: tpu7x:2x2x1
jax: 0.10.0
libtpu: 0.0.40
codegen_flags: <defaults>
</compile_context>

<pallas_src>
import functools

import jax
import jax.numpy as jnp
from jax import lax
from jax.experimental import pallas as pl
from jax.experimental.pallas import tpu as pltpu


def _round_up(x, m):
    return (x + m - 1) // m * m


def _extra_encoding_kernel(feat_ref, pos_ids_ref, seg_ids_ref,
                           pos_tab_ref, seg_tab_ref, gamma_ref, beta_ref,
                           out_ref, *, eps):
    f32 = jnp.float32
    x = feat_ref[...].astype(f32)                       # (TM, H)
    tm = x.shape[0]

    # In-kernel embedding "gathers" as one-hot matmuls on the idle MXU.
    # Both tables are VMEM-resident across the whole grid.
    pos_ids = pos_ids_ref[...]                          # (TM, 1) int32
    seg_ids = seg_ids_ref[...]                          # (TM, 1) int32
    max_pos = pos_tab_ref.shape[0]
    n_seg = seg_tab_ref.shape[0]

    pos_oh = (pos_ids == lax.broadcasted_iota(jnp.int32, (tm, max_pos), 1)).astype(f32)
    seg_oh = (seg_ids == lax.broadcasted_iota(jnp.int32, (tm, n_seg), 1)).astype(f32)

    x = x + jnp.dot(seg_oh, seg_tab_ref[...].astype(f32), preferred_element_type=f32)
    x = x + jnp.dot(pos_oh, pos_tab_ref[...].astype(f32), preferred_element_type=f32)

    # LayerNorm over the hidden (lane) dim; centered two-pass for robustness.
    mean = jnp.mean(x, axis=-1, keepdims=True)
    xc = x - mean
    var = jnp.mean(xc * xc, axis=-1, keepdims=True)
    inv = lax.rsqrt(var + eps)
    y = xc * inv * gamma_ref[...].astype(f32) + beta_ref[...].astype(f32)

    # TODO(synk): dropout is identity here (eval mode); training-mode RNG masking omitted.
    out_ref[...] = y.astype(out_ref.dtype)


def extra_encoding(feat_embs, position_ids, segment_ids,
                   pos_table, seg_table, gamma, beta, *,
                   eps=1e-12, block_rows=512):
    """feat_embs: (B, S, H); position_ids / segment_ids: (B, S) int32."""
    B, S, H = feat_embs.shape
    N = B * S
    MAX_POS = pos_table.shape[0]
    SEG = seg_table.shape[0]

    # Row-block size: multiple of 16 (covers f32 sublane=8 and bf16 packing),
    # capped so double-buffered in/out tiles stay well inside VMEM on all gens.
    TM = min(block_rows, _round_up(N, 16))
    N_pad = _round_up(N, TM)

    feat_flat = feat_embs.reshape(N, H)
    pos_ids_col = position_ids.reshape(N, 1).astype(jnp.int32)
    seg_ids_col = segment_ids.reshape(N, 1).astype(jnp.int32)
    if N_pad != N:
        pad = N_pad - N
        feat_flat = jnp.pad(feat_flat, ((0, pad), (0, 0)))
        pos_ids_col = jnp.pad(pos_ids_col, ((0, pad), (0, 0)))
        seg_ids_col = jnp.pad(seg_ids_col, ((0, pad), (0, 0)))

    gamma2 = gamma.reshape(1, H)
    beta2 = beta.reshape(1, H)

    kernel = functools.partial(_extra_encoding_kernel, eps=eps)
    grid = (N_pad // TM,)

    dt_bytes = jnp.dtype(feat_embs.dtype).itemsize
    cost = pl.CostEstimate(
        flops=int(2 * N * H * (MAX_POS + SEG) + 10 * N * H),
        transcendentals=int(N),
        bytes_accessed=int(2 * N * H * dt_bytes
                           + (MAX_POS + SEG + 2) * H * 4
                           + 2 * N * 4),
    )

    # VMEM budget: 2x double-buffered (TM,H) feat/out tiles + resident tables
    # + ids + params; cap at 64 MiB so the request is valid on v7x.
    vmem_needed = 4 * (4 * TM * H + MAX_POS * H + SEG * H + 2 * H + 4 * TM) + (1 << 20)
    vmem_limit = int(min(64 * 1024 * 1024, max(32 * 1024 * 1024, 2 * vmem_needed)))

    out_flat = pl.pallas_call(
        kernel,
        out_shape=jax.ShapeDtypeStruct((N_pad, H), feat_embs.dtype),
        grid=grid,
        in_specs=[
            pl.BlockSpec((TM, H), lambda i: (i, 0)),        # feat rows
            pl.BlockSpec((TM, 1), lambda i: (i, 0)),        # position ids
            pl.BlockSpec((TM, 1), lambda i: (i, 0)),        # segment ids
            pl.BlockSpec((MAX_POS, H), lambda i: (0, 0)),   # pos table (VMEM-resident)
            pl.BlockSpec((SEG, H), lambda i: (0, 0)),       # seg table (VMEM-resident)
            pl.BlockSpec((1, H), lambda i: (0, 0)),         # gamma
            pl.BlockSpec((1, H), lambda i: (0, 0)),         # beta
        ],
        out_specs=pl.BlockSpec((TM, H), lambda i: (i, 0)),
        compiler_params=pltpu.CompilerParams(
            dimension_semantics=("parallel",),
            vmem_limit_bytes=vmem_limit),
        cost_estimate=cost,
    )(feat_flat, pos_ids_col, seg_ids_col, pos_table, seg_table, gamma2, beta2)

    return out_flat[:N].reshape(B, S, H)


def extra_encoding_ref(feat_embs, position_ids, segment_ids,
                       pos_table, seg_table, gamma, beta, *, eps=1e-12):
    """Plain-JAX reference for correctness checking."""
    x = feat_embs + seg_table[segment_ids] + pos_table[position_ids]
    mean = jnp.mean(x, axis=-1, keepdims=True)
    var = jnp.mean((x - mean) ** 2, axis=-1, keepdims=True)
    y = (x - mean) * lax.rsqrt(var + eps)
    return y * gamma + beta


if __name__ == "__main__":
    # Small shapes consistent with the module.
    B, S, H = 2, 8, 32
    MAX_POS = 64           # max_position_embeddings (small for the demo)
    SEG_TYPES = 2          # segment_type_size
    EPS = 1e-12

    key = jax.random.PRNGKey(0)
    k_feat, k_pos, k_seg, k_gamma, k_beta = jax.random.split(key, 5)

    # Deterministic "parameters": embedding tables ~ N(0,1) like nn.Embedding
    # default; LayerNorm gamma~1, beta~0 (perturbed so the affine is exercised).
    pos_table = jax.random.normal(k_pos, (MAX_POS, H), dtype=jnp.float32)
    seg_table = jax.random.normal(k_seg, (SEG_TYPES, H), dtype=jnp.float32)
    gamma = jnp.ones((H,), jnp.float32) + 0.01 * jax.random.normal(k_gamma, (H,), jnp.float32)
    beta = 0.01 * jax.random.normal(k_beta, (H,), jnp.float32)

    # Inputs.
    feat_embs = jax.random.normal(k_feat, (B, S, H), dtype=jnp.float32)
    position_ids = jnp.broadcast_to(jnp.arange(S, dtype=jnp.int32), (B, S))
    segment_ids = jnp.concatenate(
        [jnp.zeros((B, S // 2), jnp.int32), jnp.ones((B, S - S // 2), jnp.int32)], axis=1)

    out = extra_encoding(feat_embs, position_ids, segment_ids,
                         pos_table, seg_table, gamma, beta, eps=EPS)
    out = jax.block_until_ready(out)

    ref = extra_encoding_ref(feat_embs, position_ids, segment_ids,
                             pos_table, seg_table, gamma, beta, eps=EPS)
    assert out.shape == (B, S, H)
    assert jnp.allclose(out, ref, atol=1e-5, rtol=1e-5), "mismatch vs reference"

    print("KERNEL_OK")
</pallas_src>

<mosaic_0001>
module attributes {stable_mosaic.version = 11 : i64} {
  func.func @_extra_encoding_kernel(%arg0: i32, %arg1: memref<16x32xf32, #tpu.memory_space<vmem>>, %arg2: memref<16x1xi32, #tpu.memory_space<vmem>>, %arg3: memref<16x1xi32, #tpu.memory_space<vmem>>, %arg4: memref<64x32xf32, #tpu.memory_space<vmem>>, %arg5: memref<2x32xf32, #tpu.memory_space<vmem>>, %arg6: memref<1x32xf32, #tpu.memory_space<vmem>>, %arg7: memref<1x32xf32, #tpu.memory_space<vmem>>, %arg8: memref<16x32xf32, #tpu.memory_space<vmem>>) attributes {dimension_semantics = [#tpu.dimension_semantics<parallel>], iteration_bounds = array<i64: 1>, scalar_prefetch = 0 : i64, scratch_operands = 0 : i64, tpu.core_type = #tpu.core_type<tc>, window_params = [{transform_indices = @transform_0, window_bounds = array<i64: 16, 32>}, {transform_indices = @transform_1, window_bounds = array<i64: 16, 1>}, {transform_indices = @transform_2, window_bounds = array<i64: 16, 1>}, {pipeline_mode = #tpu.pipeline_mode<synchronous>, transform_indices = @transform_3, window_bounds = array<i64: 64, 32>}, {pipeline_mode = #tpu.pipeline_mode<synchronous>, transform_indices = @transform_4, window_bounds = array<i64: 2, 32>}, {pipeline_mode = #tpu.pipeline_mode<synchronous>, transform_indices = @transform_5, window_bounds = array<i64: 1, 32>}, {pipeline_mode = #tpu.pipeline_mode<synchronous>, transform_indices = @transform_6, window_bounds = array<i64: 1, 32>}, {transform_indices = @transform_7, window_bounds = array<i64: 16, 32>}]} {
    %c0 = arith.constant 0 : index
    %c0_0 = arith.constant 0 : index
    %0 = vector.load %arg1[%c0, %c0_0] : memref<16x32xf32, #tpu.memory_space<vmem>>, vector<16x32xf32>
    %c0_1 = arith.constant 0 : index
    %c0_2 = arith.constant 0 : index
    %1 = vector.load %arg2[%c0_1, %c0_2] : memref<16x1xi32, #tpu.memory_space<vmem>>, vector<16x1xi32>
    %c0_3 = arith.constant 0 : index
    %c0_4 = arith.constant 0 : index
    %2 = vector.load %arg3[%c0_3, %c0_4] : memref<16x1xi32, #tpu.memory_space<vmem>>, vector<16x1xi32>
    %3 = tpu.iota {dimensions = array<i32: 1>} : vector<16x64xi32>
    %4 = vector.broadcast %1 : vector<16x1xi32> to vector<16x64xi32>
    %5 = arith.cmpi eq, %4, %3 : vector<16x64xi32>
    %6 = arith.extui %5 : vector<16x64xi1> to vector<16x64xi32>
    %7 = arith.sitofp %6 : vector<16x64xi32> to vector<16x64xf32>
    %8 = tpu.iota {dimensions = array<i32: 1>} : vector<16x2xi32>
    %9 = vector.broadcast %2 : vector<16x1xi32> to vector<16x2xi32>
    %10 = arith.cmpi eq, %9, %8 : vector<16x2xi32>
    %11 = arith.extui %10 : vector<16x2xi1> to vector<16x2xi32>
    %12 = arith.sitofp %11 : vector<16x2xi32> to vector<16x2xf32>
    %c0_5 = arith.constant 0 : index
    %c0_6 = arith.constant 0 : index
    %13 = vector.load %arg5[%c0_5, %c0_6] : memref<2x32xf32, #tpu.memory_space<vmem>>, vector<2x32xf32>
    %cst = arith.constant dense<0.000000e+00> : vector<16x32xf32>
    %14 = tpu.matmul %12, %13, %cst {dimension_numbers = #tpu.dot_dimension_numbers<[1], [0], [0], [1], [0, 0, 1, 1], [], []>} : vector<16x2xf32>, vector<2x32xf32>, vector<16x32xf32> -> vector<16x32xf32>
    %15 = arith.addf %0, %14 : vector<16x32xf32>
    %c0_7 = arith.constant 0 : index
    %c0_8 = arith.constant 0 : index
    %16 = vector.load %arg4[%c0_7, %c0_8] : memref<64x32xf32, #tpu.memory_space<vmem>>, vector<64x32xf32>
    %cst_9 = arith.constant dense<0.000000e+00> : vector<16x32xf32>
    %17 = tpu.matmul %7, %16, %cst_9 {dimension_numbers = #tpu.dot_dimension_numbers<[1], [0], [0], [1], [0, 0, 1, 1], [], []>} : vector<16x64xf32>, vector<64x32xf32>, vector<16x32xf32> -> vector<16x32xf32>
    %18 = arith.addf %15, %17 : vector<16x32xf32>
    %cst_10 = arith.constant dense<0.000000e+00> : vector<16xf32>
    %19 = vector.multi_reduction <add>, %18, %cst_10 [1] : vector<16x32xf32> to vector<16xf32>
    %20 = vector.shape_cast %19 : vector<16xf32> to vector<16x1xf32>
    %cst_11 = arith.constant 3.200000e+01 : f32
    %21 = vector.broadcast %cst_11 : f32 to vector<16x1xf32>
    %22 = arith.divf %20, %21 : vector<16x1xf32>
    %23 = vector.broadcast %22 : vector<16x1xf32> to vector<16x32xf32>
    %24 = arith.subf %18, %23 : vector<16x32xf32>
    %25 = arith.mulf %24, %24 : vector<16x32xf32>
    %cst_12 = arith.constant dense<0.000000e+00> : vector<16xf32>
    %26 = vector.multi_reduction <add>, %25, %cst_12 [1] : vector<16x32xf32> to vector<16xf32>
    %27 = vector.shape_cast %26 : vector<16xf32> to vector<16x1xf32>
    %cst_13 = arith.constant 3.200000e+01 : f32
    %28 = vector.broadcast %cst_13 : f32 to vector<16x1xf32>
    %29 = arith.divf %27, %28 : vector<16x1xf32>
    %cst_14 = arith.constant 9.99999996E-13 : f32
    %30 = vector.broadcast %cst_14 : f32 to vector<16x1xf32>
    %31 = arith.addf %29, %30 : vector<16x1xf32>
    %32 = math.rsqrt %31 : vector<16x1xf32>
    %33 = vector.broadcast %32 : vector<16x1xf32> to vector<16x32xf32>
    %34 = arith.mulf %24, %33 : vector<16x32xf32>
    %c0_15 = arith.constant 0 : index
    %c0_16 = arith.constant 0 : index
    %35 = vector.load %arg6[%c0_15, %c0_16] : memref<1x32xf32, #tpu.memory_space<vmem>>, vector<1x32xf32>
    %36 = vector.broadcast %35 : vector<1x32xf32> to vector<16x32xf32>
    %37 = arith.mulf %34, %36 : vector<16x32xf32>
    %c0_17 = arith.constant 0 : index
    %c0_18 = arith.constant 0 : index
    %38 = vector.load %arg7[%c0_17, %c0_18] : memref<1x32xf32, #tpu.memory_space<vmem>>, vector<1x32xf32>
    %39 = vector.broadcast %38 : vector<1x32xf32> to vector<16x32xf32>
    %40 = arith.addf %37, %39 : vector<16x32xf32>
    %c0_19 = arith.constant 0 : index
    %c0_20 = arith.constant 0 : index
    %41 = vector.load %arg8[%c0_19, %c0_20] : memref<16x32xf32, #tpu.memory_space<vmem>>, vector<16x32xf32>
    tpu.vector_store %arg8[%c0_19, %c0_20], %40 {strides = array<i32>} : memref<16x32xf32, #tpu.memory_space<vmem>>, vector<16x32xf32>,
    return
  }
  func.func @transform_0(%arg0: i32) -> (i32, i32) {
    %c0_i32 = arith.constant 0 : i32
    %c0_i32_0 = arith.constant 0 : i32
    return %arg0, %c0_i32 : i32, i32
  }
  func.func @transform_1(%arg0: i32) -> (i32, i32) {
    %c0_i32 = arith.constant 0 : i32
    %c0_i32_0 = arith.constant 0 : i32
    return %arg0, %c0_i32 : i32, i32
  }
  func.func @transform_2(%arg0: i32) -> (i32, i32) {
    %c0_i32 = arith.constant 0 : i32
    %c0_i32_0 = arith.constant 0 : i32
    return %arg0, %c0_i32 : i32, i32
  }
  func.func @transform_3(%arg0: i32) -> (i32, i32) {
    %c0_i32 = arith.constant 0 : i32
    %c0_i32_0 = arith.constant 0 : i32
    %c0_i32_1 = arith.constant 0 : i32
    return %c0_i32, %c0_i32_0 : i32, i32
  }
  func.func @transform_4(%arg0: i32) -> (i32, i32) {
    %c0_i32 = arith.constant 0 : i32
    %c0_i32_0 = arith.constant 0 : i32
    %c0_i32_1 = arith.constant 0 : i32
    return %c0_i32, %c0_i32_0 : i32, i32
  }
  func.func @transform_5(%arg0: i32) -> (i32, i32) {
    %c0_i32 = arith.constant 0 : i32
    %c0_i32_0 = arith.constant 0 : i32
    %c0_i32_1 = arith.constant 0 : i32
    return %c0_i32, %c0_i32_0 : i32, i32
  }
  func.func @transform_6(%arg0: i32) -> (i32, i32) {
    %c0_i32 = arith.constant 0 : i32
    %c0_i32_0 = arith.constant 0 : i32
    %c0_i32_1 = arith.constant 0 : i32
    return %c0_i32, %c0_i32_0 : i32, i32
  }
  func.func @transform_7(%arg0: i32) -> (i32, i32) {
    %c0_i32 = arith.constant 0 : i32
    %c0_i32_0 = arith.constant 0 : i32
    return %arg0, %c0_i32 : i32, i32
  }
}

</mosaic_0001>

<bundles_post_ra>
// kernel: tpu_custom_call.1
= control target key start
LH: loop header
LB: loop body
LE: loop exit
PB: predicated region body
PF: predicated region fallthrough
CT: control target
= control target key end

     0   :  { %v407_v2 = vmov 0   ;;  %s521_s0 = inlined_call_operand.vmem [shape: f32[16,32], index: 0, kind: input, shape index: {}]   ;;  %s522_s1 = inlined_call_operand.vmem [shape: s32[16,1], index: 1, kind: input, shape index: {}]   ;;  %s523_s2 = inlined_call_operand.vmem [shape: s32[16,1], index: 2, kind: input, shape index: {}]   ;;  %s524_s3 = inlined_call_operand.vmem [shape: f32[64,32], index: 3, kind: input, shape index: {}]   ;;  %s525_s4 = inlined_call_operand.vmem [shape: f32[2,32], index: 4, kind: input, shape index: {}]   ;;  %s526_s5 = inlined_call_operand.vmem [shape: f32[1,32], index: 5, kind: input, shape index: {}]   ;;  %s527_s6 = inlined_call_operand.vmem [shape: f32[1,32], index: 6, kind: input, shape index: {}]   ;;  %s528_s7 = inlined_call_operand.hbm [shape: f32[16,32], index: 7, kind: output, shape index: {}]  }
   0x1   :  { %v31_v0 = vld [vmem:[%s523_s2] sm:$0xff]  ;;  %378 = vset.pattern.permute.xlu1 %v407_v2  ;;  %377 = vset.pattern.permute.xlu0 %v407_v2  ;;  %v149_v4 = vld [vmem:[%s524_s3 + $0x8] sm:$0xff]  ;;  %v150_v7 = vld [vmem:[%s524_s3 + $0x10] sm:$0xff] }
   0x2   :  { %v29_v1 = vld [vmem:[%s522_s1] sm:$0xff]  ;;  %48 = vperm.xlu0 %377, %v31_v0   ;;  %v32_v5 = vld [vmem:[%s523_s2 + $0x8] sm:$0xff]  ;;  %v151_v8 = vld [vmem:[%s524_s3 + $0x18] sm:$0xff] }
   0x3   :  { %v148_v3 = vld [vmem:[%s524_s3] sm:$0xff]  ;;  %36 = vperm.xlu1 %378, %v29_v1   ;;  %v30_v9 = vld [vmem:[%s522_s1 + $0x8] sm:$0xff]  ;;  %v356_v10 = vpack.c.bf16 %v151_v8, %v150_v7 }
   0x4   :  { %v352_v6 = vpack.c.bf16 %v149_v4, %v148_v3  ;;  %v152_v11 = vld [vmem:[%s524_s3 + $0x20] sm:$0xff]  ;;  %v153_v12 = vld [vmem:[%s524_s3 + $0x28] sm:$0xff] }
   0x6   :  { %353 = vmatprep.subr.bf16.mxu0 %v352_v6 }
   0x7   :  { %12 = vsyncpa [#allocation3], 0  ;;  %355 = vmatpush3.bf16.msra.mxu0 %v352_v6  ;;  %v59_v13 = vld [vmem:[%s525_s4] sm:$0x3]  ;;  %vm67_vm0 = vcmask 1041408   ;;  %51 = vperm.xlu0 %377, %v32_v5   ;;  %v360_v14 = vpack.c.bf16 %v153_v12, %v152_v11  ;;  %v154_v15 = vld [vmem:[%s524_s3 + $0x30] sm:$0xff]  ;;  %v33_v18 = vlaneseq }
   0x8   :  { %39 = vperm.xlu1 %378, %v30_v9   ;;  %357 = vmatprep.subr.bf16.mxu0 %v356_v10  ;;  %v155_v16 = vld [vmem:[%s524_s3 + $0x38] sm:$0xff]  ;;  %vm60_vm1 = vcmask 15360   ;;  %vm156_vm2 = vcmask 523264   ;;  %v408_v22 = vmov 0.0   ;;  %v28_v29 = vld [vmem:[%s521_s0 + $0x8] sm:$0xff]  ;;  %v27_v30 = vld [vmem:[%s521_s0] sm:$0xff] }
   0x9   :  { %328 = vmatprep.subr.msk.mxu1 %vm67_vm0, %v59_v13  ;;  %v364_v17 = vpack.c.bf16 %v155_v16, %v154_v15  ;;  %v34_v19 = vand.u32 127, %v33_v18  ;;  %vm240_vm7 = vcmask 261120   ;;  %v313_v58 = vld [vmem:[%s526_s5] ss:$0 sm:$0xff]  ;;  %s409_s30 = smov [#allocation2]  }
   0xa   :  { %329 = vmatpush3.msk.msra.mxu1 %vm67_vm0, %v59_v13  ;;  %v314_v60 = vld [vmem:[%s527_s6] ss:$0 sm:$0xff]  ;;  %s293_s8 = sshll.u32 %s409_s30, 4  ;;  %s294_s8 = int_to_ptr.vmem [resolvable:$true] %s293_s8 }
   0xb   :  { %359 = vmatpush3.bf16.msra.mxu0 %v356_v10  ;;  %s383_s9 = scalar_lea.vmem %s294_s8, 256  ;;  %p388_p1 = scmp.lt.s32.totalorder %s294_s8, %s294_s8 }
   0xc   :  { %361 = vmatprep.subr.bf16.mxu0 %v360_v14  ;;  %p384_p0 = scmp.ne.s32.totalorder %s294_s8, %s383_s9  ;;  %p389_p2 = scmp.lt.s32.totalorder %s383_s9, %s383_s9 }
   0xe   :  { %p390_p3 = por %p389_p2, %p388_p1 }
   0xf   :  { %363 = vmatpush3.bf16.msra.mxu0 %v360_v14 }
  0x10   :  { %365 = vmatprep.subr.bf16.mxu0 %v364_v17  ;;  %p391_p4 = pnand %p390_p3, %p384_p0 }
  0x13   :  { %367 = vmatpush3.bf16.msra.mxu0 %v364_v17 }
  0x81   :  { %v49_v20 = vpop.permute.xlu0 %48 }
  0x82   :  { %v37_v21 = vpop.permute.xlu1 %36  ;;  %vm53_vm3 = vcmp.eq.s32.totalorder %v49_v20, %v34_v19 }
  0x83   :  { %vm41_vm4 = vcmp.eq.s32.totalorder %v37_v21, %v34_v19  ;;  %v306_v23 = vsel %vm53_vm3, 1.0, %v408_v22 }
  0x84   :  { %v304_v24 = vsel %vm41_vm4, 1.0, %v408_v22  ;;  %330 = vmatprep.mubr.msk.f32.mxu1 %vm60_vm1, %v306_v23 }
  0x85   :  { %349 = vmatprep.mubr.msk.f32.mxu0 %vm156_vm2, %v304_v24 }
  0x86   :  { %v52_v25 = vpop.permute.xlu0 %51 }
  0x87   :  { %v40_v26 = vpop.permute.xlu1 %39  ;;  %vm54_vm5 = vcmp.eq.s32.totalorder %v52_v25, %v34_v19 }
  0x88   :  { %vm42_vm6 = vcmp.eq.s32.totalorder %v40_v26, %v34_v19  ;;  %v307_v27 = vsel %vm54_vm5, 1.0, %v408_v22 }
  0x89   :  { %v305_v28 = vsel %vm42_vm6, 1.0, %v408_v22  ;;  %331 = vmatmul.mubr.msk.f32.vlgmr.msra.gmra.mrb[0].mxu1 %vm60_vm1, %v307_v27 }
  0x8a   :  { %350 = vmatmul.mubr.msk.f32.vlgmr.msra.gmra.mrb[0].mxu0 %vm156_vm2, %v305_v28 }
 0x15c   :  { %v332_v31 = vpop.f32.mrb[0].mxu1 }
 0x15d   :  { %v351_v32 = vpop.f32.mrb[0].mxu0  ;;  %v147_v33 = vadd.f32 %v332_v31, %v28_v29  ;;  %v137_v34 = vpop.f32.mrb[1].mxu1 }
 0x15e   :  { %v229_v35 = vpop.f32.mrb[1].mxu0  ;;  %v146_v36 = vadd.f32 %v137_v34, %v27_v30 }
 0x15f   :  { %v239_v37 = vadd.f32 %v351_v32, %v147_v33 }
 0x160   :  { %v238_v38 = vadd.f32 %v229_v35, %v146_v36 }
 0x161   :  { %v244_v39 = vsel %vm240_vm7, %v239_v37, 0.0 }
 0x162   :  { %245 = vadd.xlane.f32.xlu1 %v244_v39  ;;  %v241_v40 = vsel %vm240_vm7, %v238_v38, 0.0 }
 0x163   :  { %242 = vadd.xlane.f32.xlu0 %v241_v40 }
 0x1ef   :  { %v246_v41 = vpop.xlane.xlu1 %245 }
 0x1f0   :  { %v249_v42 = vmul.f32 0.03125, %v246_v41  ;;  %v243_v43 = vpop.xlane.xlu0 %242 }
 0x1f1   :  { %v248_v44 = vmul.f32 0.03125, %v243_v43 }
 0x1f2   :  { %v251_v45 = vsub.f32 %v239_v37, %v249_v42 }
 0x1f3   :  { %v250_v46 = vsub.f32 %v238_v38, %v248_v44 }
 0x1f4   :  { %v253_v49 = vmul.f32 %v251_v45, %v251_v45 }
 0x1f5   :  { %v252_v47 = vmul.f32 %v250_v46, %v250_v46 }
 0x1f6   :  { %v257_v50 = vsel %vm240_vm7, %v253_v49, 0.0 }
 0x1f7   :  { %v254_v48 = vsel %vm240_vm7, %v252_v47, 0.0 }
 0x1f8   :  { %255 = vadd.xlane.f32.xlu0 %v254_v48 }
 0x1fc   :  { %258 = vadd.xlane.f32.xlu0 %v257_v50 }
 0x285   :  { %v256_v51 = vpop.xlane.xlu0 %255 }
 0x286   :  { %v260_v52 = vmul.f32 0.03125, %v256_v51 }
 0x288   :  { %v262_v53 = vadd.f32 1e-12, %v260_v52 }
 0x289   :  { %v259_v54 = vpop.xlane.xlu0 %258 }
 0x28a   :  { %379 = vrsqrt.f32 %v262_v53  ;;  %v261_v55 = vmul.f32 0.03125, %v259_v54 }
 0x28c   :  { %v263_v56 = vadd.f32 1e-12, %v261_v55 }
 0x28e   :  { %381 = vrsqrt.f32 %v263_v56 }
 0x294   :  { %v380_v57 = vpop.eup %379 }
 0x295   :  { %v266_v59 = vmul.f32 %v380_v57, %v250_v46 }
 0x297   :  { %v275_v61 = vmul.f32 %v313_v58, %v266_v59 }
 0x298   :  { %v382_v62 = vpop.eup %381 }
 0x299   :  { %v267_v63 = vmul.f32 %v382_v62, %v251_v45  ;;  %v284_v0 = vadd.f32 %v314_v60, %v275_v61 }
 0x29b   :  { %v276_v1 = vmul.f32 %v313_v58, %v267_v63  ;;  %286 = vst.msk [vmem:[#allocation2] sm:$0xff] %vm240_vm7, %v284_v0 }
 0x29d   :  { %v285_v2 = vadd.f32 %v314_v60, %v276_v1 }
 0x29f   :  { %287 = vst.msk [vmem:[#allocation2 + $0x8] sm:$0xff] %vm240_vm7, %v285_v2 }
 0x2a0   :  { %394 = shalt.err (!%p391_p4)
}
 0x2a1   :  { %s395_s10 = scalar_lea.hbm %s528_s7, 256 }
 0x2a2   :  { %p396_p5 = scmp.ne.s32.totalorder %s528_s7, %s395_s10  ;;  %p399_p6 = scmp.lt.u32.totalorder %s395_s10, %s528_s7 }
 0x2a4   :  { %p401_p7 = pnand %p399_p6, %p396_p5 }
 0x2a6   :  { %404 = shalt.err (!%p401_p7)
}
 0x2a7   :  { %s410_s15 = smov 128   ;;  %s411_s16 = smov 8  }
 0x2a8   :  { %299 = dma.vmem_to_hbm [thread:$0]  %s294_s8, 256, %s528_s7, [#allocation3], %s410_s15, %s410_s15, %s411_s16  }
 0x2a9   :  { %405 = dma.done.wait [#allocation3], 256  }
 0x2aa   :  { %406 = vsyncadd [#allocation3], 4294967040 }
 0x2ab   :  { %303 = vsyncpa [#allocation3], 1 }

</bundles_post_ra>
